<compile_context>
chip_gen: v7x
topology: tpu7x:2x2x1
jax: 0.10.0
libtpu: 0.0.40
codegen_flags: <defaults>
</compile_context>

<pallas_src>
import functools
import math

import jax
import jax.numpy as jnp
from jax.experimental import pallas as pl
from jax.experimental.pallas import tpu as pltpu


def _sru_kernel(x_ref, w_ref, b_ref, wg_ref, o_ref, *,
                group_num, gate_logit, gn_eps, n_per_group):
    """One block of samples: GroupBatchnorm2d -> gate -> cross-channel add."""
    x = x_ref[...].astype(jnp.float32)            # (TB, C, HW)
    TB, C, HW = x.shape
    G = group_num
    cg = C // G
    n = float(n_per_group)

    def group_fold_bcast(v):
        # v: (TB, C, 1) per-channel partials -> (TB, C, 1) where every channel
        # holds the sum over its group.  Tiny-array ops only (static sublane
        # slices + sublane reduce + one concat); no reshape of the big tile.
        if cg == 1:
            return v
        parts = []
        for g in range(G):
            sl = v[:, g * cg:(g + 1) * cg, :]                 # (TB, cg, 1)
            tot = jnp.sum(sl, axis=1, keepdims=True)          # (TB, 1, 1)
            parts.append(jnp.broadcast_to(tot, (TB, cg, 1)))
        return jnp.concatenate(parts, axis=1)                 # (TB, C, 1)

    # ---- GroupBatchnorm2d statistics: two-pass (mean, then centered SS) ----
    s_c = jnp.sum(x, axis=-1, keepdims=True)                  # (TB, C, 1)
    mean_c = group_fold_bcast(s_c) * (1.0 / n)                # per-group mean

    d = x - mean_c                                            # (TB, C, HW)
    ss_c = jnp.sum(d * d, axis=-1, keepdims=True)             # (TB, C, 1)
    var_c = group_fold_bcast(ss_c) * (1.0 / (n - 1.0))        # unbiased (torch.std)
    inv_c = 1.0 / (jnp.sqrt(var_c) + gn_eps)                  # eps on std (module)

    w = w_ref[...][None]                                      # (1, C, 1)
    b = b_ref[...][None]                                      # (1, C, 1)
    wg = wg_ref[...][None]                                    # (1, C, 1) = w/sum(w)

    # Normalize + affine folded into one broadcast FMA per element.
    gn = d * (w * inv_c) + b                                  # (TB, C, HW)

    # Gate: sigmoid(gn * w_gamma) >= t  <=>  gn * w_gamma >= logit(t).
    info = (gn * wg) >= gate_logit
    x1 = jnp.where(info, gn, 0.0)                             # info_mask * gn
    x2 = jnp.where(info, 0.0, gn)                             # noninfo_mask * gn

    # Reconstruct: cross-add the two channel halves, then ONE full-width
    # lane-dense store (half swap = sublane shuffle, lands on the XLU slot).
    half = C // 2
    x2_swap = jnp.concatenate([x2[:, half:, :], x2[:, :half, :]], axis=1)
    o_ref[...] = (x1 + x2_swap).astype(o_ref.dtype)


def sru_forward(x, weight, bias, *, group_num=16, gate_threshold=0.5,
                gn_eps=1e-10):
    """x: (N, C, H, W); weight/bias: C-element GroupBatchnorm2d parameters."""
    N, C, H, W = x.shape
    G = group_num
    assert C >= G and C % G == 0 and C % 2 == 0
    assert 0.0 < gate_threshold < 1.0
    HW = H * W
    n_per_group = (C // G) * HW
    assert n_per_group > 1, "std over a single element is undefined"

    x3 = x.reshape(N, C, HW)                      # free, contiguous view

    w2 = jnp.asarray(weight, jnp.float32).reshape(C, 1)
    b2 = jnp.asarray(bias, jnp.float32).reshape(C, 1)
    # Grid-invariant gating quantities hoisted out of the kernel.  Note:
    # w_gamma blows up if sum(weight) ~ 0 (same behavior as the PyTorch module).
    wg2 = w2 / jnp.sum(w2)
    gate_logit = float(math.log(gate_threshold / (1.0 - gate_threshold)))

    # ---- generation-aware block sizing -------------------------------------
    # HBM-bandwidth bound on v5e/v6e (near VALU-bound on v7x): large lane-dense
    # blocks are the main lever.  Budget with 4 B/elem (in-kernel f32 working
    # set) so bf16 inputs do not undercount, and keep double-buffered I/O plus
    # ~6 f32 temporaries inside the per-generation VMEM capacity.
    try:
        vmem_cap = int(pltpu.get_tpu_info().vmem_capacity_bytes)
    except Exception:  # be conservative if the query is unavailable
        vmem_cap = 64 << 20
    target_block_f32 = (6 << 20) if vmem_cap >= (100 << 20) else (3 << 20)

    itemsize = jnp.dtype(x.dtype).itemsize
    bytes_per_sample_io = C * HW * itemsize
    bytes_per_sample_f32 = C * HW * 4

    tb = max(1, target_block_f32 // bytes_per_sample_f32)
    tb = min(tb, N)
    if N >= 2:
        # >= 2 grid steps: pipelining overlap + both v7x TensorCores get work.
        tb = min(tb, pl.cdiv(N, 2))
    # cdiv grid: awkward N (prime, N = k*tb+1, ...) never collapses tb.  The
    # ragged last block's garbage rows never mix with valid samples (all stats
    # are per-sample) and its out-of-bounds rows are masked on writeback.
    grid = (pl.cdiv(N, tb),)
    # TODO(synk): add a spatial (HW) or channel-group grid axis with a two-pass
    # stats scheme for very large single-sample feature maps and to give v7x
    # >= 4 parallel steps when N is tiny.

    block_io = tb * bytes_per_sample_io
    block_f32 = tb * bytes_per_sample_f32
    vmem_needed = 4 * block_io + 6 * block_f32 + (2 << 20)
    vmem_limit = int(min(max(vmem_needed, 32 << 20), (vmem_cap * 3) // 4))

    kernel = functools.partial(
        _sru_kernel,
        group_num=G,
        gate_logit=gate_logit,
        gn_eps=gn_eps,
        n_per_group=n_per_group,
    )

    out = pl.pallas_call(
        kernel,
        out_shape=jax.ShapeDtypeStruct((N, C, HW), x.dtype),
        grid=grid,
        in_specs=[
            # Last two block dims equal the full array dims -> legal even when
            # HW % 128 != 0 (masked tail loads/stores); no wrapper pad/slice.
            pl.BlockSpec((tb, C, HW), lambda i: (i, 0, 0)),
            pl.BlockSpec((C, 1), lambda i: (0, 0)),
            pl.BlockSpec((C, 1), lambda i: (0, 0)),
            pl.BlockSpec((C, 1), lambda i: (0, 0)),
        ],
        out_specs=pl.BlockSpec((tb, C, HW), lambda i: (i, 0, 0)),
        compiler_params=pltpu.CompilerParams(
            dimension_semantics=("parallel",),
            vmem_limit_bytes=vmem_limit,
        ),
    )(x3, w2, b2, wg2)

    return out.reshape(N, C, H, W)


def _sru_reference(x, weight, bias, *, group_num=16, gate_threshold=0.5,
                   gn_eps=1e-10):
    """Pure-JAX mirror of the PyTorch module. Returns (out, reweights)."""
    N, C, H, W = x.shape
    xg = x.reshape(N, group_num, -1)
    mean = jnp.mean(xg, axis=2, keepdims=True)
    n = xg.shape[2]
    std = jnp.sqrt(jnp.sum((xg - mean) ** 2, axis=2, keepdims=True) / (n - 1))
    xn = ((xg - mean) / (std + gn_eps)).reshape(N, C, H, W)
    gn_x = xn * weight.reshape(1, C, 1, 1) + bias.reshape(1, C, 1, 1)
    w_gamma = (weight / jnp.sum(weight)).reshape(1, C, 1, 1)
    rew = jax.nn.sigmoid(gn_x * w_gamma)
    info = rew >= gate_threshold
    x1 = jnp.where(info, gn_x, 0.0)
    x2 = jnp.where(info, 0.0, gn_x)
    half = C // 2
    out = jnp.concatenate(
        [x1[:, :half] + x2[:, half:], x1[:, half:] + x2[:, :half]], axis=1)
    return out, rew


def _check(out, ref, rew, tol=1e-4):
    # Exclude gate decisions sitting within float rounding of the sigmoid
    # boundary (the kernel's exact logit comparison may legitimately flip
    # there); an output channel depends on its own gate and its partner's.
    C = out.shape[1]
    half = C // 2
    solid = jnp.abs(rew - 0.5) > 1e-6
    solid_swap = jnp.concatenate([solid[:, half:], solid[:, :half]], axis=1)
    err = jnp.where(solid & solid_swap, jnp.abs(out - ref), 0.0)
    max_err = float(jnp.max(err))
    assert max_err < tol, f"max abs err {max_err}"


if __name__ == "__main__":
    key = jax.random.PRNGKey(0)
    k1, k2, k3 = jax.random.split(key, 3)

    group_num = 16

    # Case 1: oup_channels=32, 16x16 feature map (HW = 256, lane-aligned).
    N, C, H, W = 2, 32, 16, 16
    x = jax.random.normal(k1, (N, C, H, W), dtype=jnp.float32)
    weight = jax.random.normal(k2, (C,), dtype=jnp.float32)   # torch.randn(c,1,1)
    bias = jnp.zeros((C,), dtype=jnp.float32)                 # torch.zeros(c,1,1)

    out = jax.block_until_ready(sru_forward(x, weight, bias, group_num=group_num))
    ref, rew = _sru_reference(x, weight, bias, group_num=group_num)
    assert out.shape == (N, C, H, W)
    _check(out, ref, rew)

    # Case 2: 14x14 feature map (HW = 196, not a multiple of 128) and N=3 with
    # a ragged last grid block -> exercises the no-pad path and the cdiv grid.
    N2, H2, W2 = 3, 14, 14
    x_b = jax.random.normal(k3, (N2, C, H2, W2), dtype=jnp.float32)
    out_b = jax.block_until_ready(sru_forward(x_b, weight, bias, group_num=group_num))
    ref_b, rew_b = _sru_reference(x_b, weight, bias, group_num=group_num)
    assert out_b.shape == (N2, C, H2, W2)
    _check(out_b, ref_b, rew_b)

    print("KERNEL_OK")
</pallas_src>

<mosaic_0001>
module attributes {stable_mosaic.version = 11 : i64} {
  func.func @_sru_kernel(%arg0: i32, %arg1: memref<1x32x256xf32, #tpu.memory_space<vmem>>, %arg2: memref<32x1xf32, #tpu.memory_space<vmem>>, %arg3: memref<32x1xf32, #tpu.memory_space<vmem>>, %arg4: memref<32x1xf32, #tpu.memory_space<vmem>>, %arg5: memref<1x32x256xf32, #tpu.memory_space<vmem>>) attributes {dimension_semantics = [#tpu.dimension_semantics<parallel>], iteration_bounds = array<i64: 2>, scalar_prefetch = 0 : i64, scratch_operands = 0 : i64, tpu.core_type = #tpu.core_type<tc>, window_params = [{transform_indices = @transform_0, window_bounds = array<i64: 1, 32, 256>}, {pipeline_mode = #tpu.pipeline_mode<synchronous>, transform_indices = @transform_1, window_bounds = array<i64: 32, 1>}, {pipeline_mode = #tpu.pipeline_mode<synchronous>, transform_indices = @transform_2, window_bounds = array<i64: 32, 1>}, {pipeline_mode = #tpu.pipeline_mode<synchronous>, transform_indices = @transform_3, window_bounds = array<i64: 32, 1>}, {transform_indices = @transform_4, window_bounds = array<i64: 1, 32, 256>}]} {
    %c0 = arith.constant 0 : index
    %c0_0 = arith.constant 0 : index
    %c0_1 = arith.constant 0 : index
    %0 = vector.load %arg1[%c0, %c0_0, %c0_1] : memref<1x32x256xf32, #tpu.memory_space<vmem>>, vector<1x32x256xf32>
    %cst = arith.constant dense<0.000000e+00> : vector<1x32xf32>
    %1 = vector.multi_reduction <add>, %0, %cst [2] : vector<1x32x256xf32> to vector<1x32xf32>
    %2 = vector.shape_cast %1 : vector<1x32xf32> to vector<1x32x1xf32>
    %3 = vector.extract_strided_slice %2 {offsets = [0, 0, 0], sizes = [1, 2, 1], strides = [1, 1, 1]} : vector<1x32x1xf32> to vector<1x2x1xf32>
    %cst_2 = arith.constant dense<0.000000e+00> : vector<1x1xf32>
    %4 = vector.multi_reduction <add>, %3, %cst_2 [1] : vector<1x2x1xf32> to vector<1x1xf32>
    %5 = vector.shape_cast %4 : vector<1x1xf32> to vector<1x1x1xf32>
    %6 = vector.shape_cast %5 : vector<1x1x1xf32> to vector<1x1x1xf32>
    %7 = vector.broadcast %6 : vector<1x1x1xf32> to vector<1x2x1xf32>
    %8 = vector.extract_strided_slice %2 {offsets = [0, 2, 0], sizes = [1, 2, 1], strides = [1, 1, 1]} : vector<1x32x1xf32> to vector<1x2x1xf32>
    %cst_3 = arith.constant dense<0.000000e+00> : vector<1x1xf32>
    %9 = vector.multi_reduction <add>, %8, %cst_3 [1] : vector<1x2x1xf32> to vector<1x1xf32>
    %10 = vector.shape_cast %9 : vector<1x1xf32> to vector<1x1x1xf32>
    %11 = vector.shape_cast %10 : vector<1x1x1xf32> to vector<1x1x1xf32>
    %12 = vector.broadcast %11 : vector<1x1x1xf32> to vector<1x2x1xf32>
    %13 = vector.extract_strided_slice %2 {offsets = [0, 4, 0], sizes = [1, 2, 1], strides = [1, 1, 1]} : vector<1x32x1xf32> to vector<1x2x1xf32>
    %cst_4 = arith.constant dense<0.000000e+00> : vector<1x1xf32>
    %14 = vector.multi_reduction <add>, %13, %cst_4 [1] : vector<1x2x1xf32> to vector<1x1xf32>
    %15 = vector.shape_cast %14 : vector<1x1xf32> to vector<1x1x1xf32>
    %16 = vector.shape_cast %15 : vector<1x1x1xf32> to vector<1x1x1xf32>
    %17 = vector.broadcast %16 : vector<1x1x1xf32> to vector<1x2x1xf32>
    %18 = vector.extract_strided_slice %2 {offsets = [0, 6, 0], sizes = [1, 2, 1], strides = [1, 1, 1]} : vector<1x32x1xf32> to vector<1x2x1xf32>
    %cst_5 = arith.constant dense<0.000000e+00> : vector<1x1xf32>
    %19 = vector.multi_reduction <add>, %18, %cst_5 [1] : vector<1x2x1xf32> to vector<1x1xf32>
    %20 = vector.shape_cast %19 : vector<1x1xf32> to vector<1x1x1xf32>
    %21 = vector.shape_cast %20 : vector<1x1x1xf32> to vector<1x1x1xf32>
    %22 = vector.broadcast %21 : vector<1x1x1xf32> to vector<1x2x1xf32>
    %23 = vector.extract_strided_slice %2 {offsets = [0, 8, 0], sizes = [1, 2, 1], strides = [1, 1, 1]} : vector<1x32x1xf32> to vector<1x2x1xf32>
    %cst_6 = arith.constant dense<0.000000e+00> : vector<1x1xf32>
    %24 = vector.multi_reduction <add>, %23, %cst_6 [1] : vector<1x2x1xf32> to vector<1x1xf32>
    %25 = vector.shape_cast %24 : vector<1x1xf32> to vector<1x1x1xf32>
    %26 = vector.shape_cast %25 : vector<1x1x1xf32> to vector<1x1x1xf32>
    %27 = vector.broadcast %26 : vector<1x1x1xf32> to vector<1x2x1xf32>
    %28 = vector.extract_strided_slice %2 {offsets = [0, 10, 0], sizes = [1, 2, 1], strides = [1, 1, 1]} : vector<1x32x1xf32> to vector<1x2x1xf32>
    %cst_7 = arith.constant dense<0.000000e+00> : vector<1x1xf32>
    %29 = vector.multi_reduction <add>, %28, %cst_7 [1] : vector<1x2x1xf32> to vector<1x1xf32>
    %30 = vector.shape_cast %29 : vector<1x1xf32> to vector<1x1x1xf32>
    %31 = vector.shape_cast %30 : vector<1x1x1xf32> to vector<1x1x1xf32>
    %32 = vector.broadcast %31 : vector<1x1x1xf32> to vector<1x2x1xf32>
    %33 = vector.extract_strided_slice %2 {offsets = [0, 12, 0], sizes = [1, 2, 1], strides = [1, 1, 1]} : vector<1x32x1xf32> to vector<1x2x1xf32>
    %cst_8 = arith.constant dense<0.000000e+00> : vector<1x1xf32>
    %34 = vector.multi_reduction <add>, %33, %cst_8 [1] : vector<1x2x1xf32> to vector<1x1xf32>
    %35 = vector.shape_cast %34 : vector<1x1xf32> to vector<1x1x1xf32>
    %36 = vector.shape_cast %35 : vector<1x1x1xf32> to vector<1x1x1xf32>
    %37 = vector.broadcast %36 : vector<1x1x1xf32> to vector<1x2x1xf32>
    %38 = vector.extract_strided_slice %2 {offsets = [0, 14, 0], sizes = [1, 2, 1], strides = [1, 1, 1]} : vector<1x32x1xf32> to vector<1x2x1xf32>
    %cst_9 = arith.constant dense<0.000000e+00> : vector<1x1xf32>
    %39 = vector.multi_reduction <add>, %38, %cst_9 [1] : vector<1x2x1xf32> to vector<1x1xf32>
    %40 = vector.shape_cast %39 : vector<1x1xf32> to vector<1x1x1xf32>
    %41 = vector.shape_cast %40 : vector<1x1x1xf32> to vector<1x1x1xf32>
    %42 = vector.broadcast %41 : vector<1x1x1xf32> to vector<1x2x1xf32>
    %43 = vector.extract_strided_slice %2 {offsets = [0, 16, 0], sizes = [1, 2, 1], strides = [1, 1, 1]} : vector<1x32x1xf32> to vector<1x2x1xf32>
    %cst_10 = arith.constant dense<0.000000e+00> : vector<1x1xf32>
    %44 = vector.multi_reduction <add>, %43, %cst_10 [1] : vector<1x2x1xf32> to vector<1x1xf32>
    %45 = vector.shape_cast %44 : vector<1x1xf32> to vector<1x1x1xf32>
    %46 = vector.shape_cast %45 : vector<1x1x1xf32> to vector<1x1x1xf32>
    %47 = vector.broadcast %46 : vector<1x1x1xf32> to vector<1x2x1xf32>
    %48 = vector.extract_strided_slice %2 {offsets = [0, 18, 0], sizes = [1, 2, 1], strides = [1, 1, 1]} : vector<1x32x1xf32> to vector<1x2x1xf32>
    %cst_11 = arith.constant dense<0.000000e+00> : vector<1x1xf32>
    %49 = vector.multi_reduction <add>, %48, %cst_11 [1] : vector<1x2x1xf32> to vector<1x1xf32>
    %50 = vector.shape_cast %49 : vector<1x1xf32> to vector<1x1x1xf32>
    %51 = vector.shape_cast %50 : vector<1x1x1xf32> to vector<1x1x1xf32>
    %52 = vector.broadcast %51 : vector<1x1x1xf32> to vector<1x2x1xf32>
    %53 = vector.extract_strided_slice %2 {offsets = [0, 20, 0], sizes = [1, 2, 1], strides = [1, 1, 1]} : vector<1x32x1xf32> to vector<1x2x1xf32>
    %cst_12 = arith.constant dense<0.000000e+00> : vector<1x1xf32>
    %54 = vector.multi_reduction <add>, %53, %cst_12 [1] : vector<1x2x1xf32> to vector<1x1xf32>
    %55 = vector.shape_cast %54 : vector<1x1xf32> to vector<1x1x1xf32>
    %56 = vector.shape_cast %55 : vector<1x1x1xf32> to vector<1x1x1xf32>
    %57 = vector.broadcast %56 : vector<1x1x1xf32> to vector<1x2x1xf32>
    %58 = vector.extract_strided_slice %2 {offsets = [0, 22, 0], sizes = [1, 2, 1], strides = [1, 1, 1]} : vector<1x32x1xf32> to vector<1x2x1xf32>
    %cst_13 = arith.constant dense<0.000000e+00> : vector<1x1xf32>
    %59 = vector.multi_reduction <add>, %58, %cst_13 [1] : vector<1x2x1xf32> to vector<1x1xf32>
    %60 = vector.shape_cast %59 : vector<1x1xf32> to vector<1x1x1xf32>
    %61 = vector.shape_cast %60 : vector<1x1x1xf32> to vector<1x1x1xf32>
    %62 = vector.broadcast %61 : vector<1x1x1xf32> to vector<1x2x1xf32>
    %63 = vector.extract_strided_slice %2 {offsets = [0, 24, 0], sizes = [1, 2, 1], strides = [1, 1, 1]} : vector<1x32x1xf32> to vector<1x2x1xf32>
    %cst_14 = arith.constant dense<0.000000e+00> : vector<1x1xf32>
    %64 = vector.multi_reduction <add>, %63, %cst_14 [1] : vector<1x2x1xf32> to vector<1x1xf32>
    %65 = vector.shape_cast %64 : vector<1x1xf32> to vector<1x1x1xf32>
    %66 = vector.shape_cast %65 : vector<1x1x1xf32> to vector<1x1x1xf32>
    %67 = vector.broadcast %66 : vector<1x1x1xf32> to vector<1x2x1xf32>
    %68 = vector.extract_strided_slice %2 {offsets = [0, 26, 0], sizes = [1, 2, 1], strides = [1, 1, 1]} : vector<1x32x1xf32> to vector<1x2x1xf32>
    %cst_15 = arith.constant dense<0.000000e+00> : vector<1x1xf32>
    %69 = vector.multi_reduction <add>, %68, %cst_15 [1] : vector<1x2x1xf32> to vector<1x1xf32>
    %70 = vector.shape_cast %69 : vector<1x1xf32> to vector<1x1x1xf32>
    %71 = vector.shape_cast %70 : vector<1x1x1xf32> to vector<1x1x1xf32>
    %72 = vector.broadcast %71 : vector<1x1x1xf32> to vector<1x2x1xf32>
    %73 = vector.extract_strided_slice %2 {offsets = [0, 28, 0], sizes = [1, 2, 1], strides = [1, 1, 1]} : vector<1x32x1xf32> to vector<1x2x1xf32>
    %cst_16 = arith.constant dense<0.000000e+00> : vector<1x1xf32>
    %74 = vector.multi_reduction <add>, %73, %cst_16 [1] : vector<1x2x1xf32> to vector<1x1xf32>
    %75 = vector.shape_cast %74 : vector<1x1xf32> to vector<1x1x1xf32>
    %76 = vector.shape_cast %75 : vector<1x1x1xf32> to vector<1x1x1xf32>
    %77 = vector.broadcast %76 : vector<1x1x1xf32> to vector<1x2x1xf32>
    %78 = vector.extract_strided_slice %2 {offsets = [0, 30, 0], sizes = [1, 2, 1], strides = [1, 1, 1]} : vector<1x32x1xf32> to vector<1x2x1xf32>
    %cst_17 = arith.constant dense<0.000000e+00> : vector<1x1xf32>
    %79 = vector.multi_reduction <add>, %78, %cst_17 [1] : vector<1x2x1xf32> to vector<1x1xf32>
    %80 = vector.shape_cast %79 : vector<1x1xf32> to vector<1x1x1xf32>
    %81 = vector.shape_cast %80 : vector<1x1x1xf32> to vector<1x1x1xf32>
    %82 = vector.broadcast %81 : vector<1x1x1xf32> to vector<1x2x1xf32>
    %83 = tpu.concatenate %7, %12, %17, %22, %27, %32, %37, %42, %47, %52, %57, %62, %67, %72, %77, %82 in 1 : vector<1x2x1xf32>, vector<1x2x1xf32>, vector<1x2x1xf32>, vector<1x2x1xf32>, vector<1x2x1xf32>, vector<1x2x1xf32>, vector<1x2x1xf32>, vector<1x2x1xf32>, vector<1x2x1xf32>, vector<1x2x1xf32>, vector<1x2x1xf32>, vector<1x2x1xf32>, vector<1x2x1xf32>, vector<1x2x1xf32>, vector<1x2x1xf32>, vector<1x2x1xf32> -> vector<1x32x1xf32>
    %cst_18 = arith.constant 0.001953125 : f32
    %84 = vector.broadcast %cst_18 : f32 to vector<1x32x1xf32>
    %85 = arith.mulf %83, %84 : vector<1x32x1xf32>
    %86 = vector.broadcast %85 : vector<1x32x1xf32> to vector<1x32x256xf32>
    %87 = arith.subf %0, %86 : vector<1x32x256xf32>
    %88 = arith.mulf %87, %87 : vector<1x32x256xf32>
    %cst_19 = arith.constant dense<0.000000e+00> : vector<1x32xf32>
    %89 = vector.multi_reduction <add>, %88, %cst_19 [2] : vector<1x32x256xf32> to vector<1x32xf32>
    %90 = vector.shape_cast %89 : vector<1x32xf32> to vector<1x32x1xf32>
    %91 = vector.extract_strided_slice %90 {offsets = [0, 0, 0], sizes = [1, 2, 1], strides = [1, 1, 1]} : vector<1x32x1xf32> to vector<1x2x1xf32>
    %cst_20 = arith.constant dense<0.000000e+00> : vector<1x1xf32>
    %92 = vector.multi_reduction <add>, %91, %cst_20 [1] : vector<1x2x1xf32> to vector<1x1xf32>
    %93 = vector.shape_cast %92 : vector<1x1xf32> to vector<1x1x1xf32>
    %94 = vector.shape_cast %93 : vector<1x1x1xf32> to vector<1x1x1xf32>
    %95 = vector.broadcast %94 : vector<1x1x1xf32> to vector<1x2x1xf32>
    %96 = vector.extract_strided_slice %90 {offsets = [0, 2, 0], sizes = [1, 2, 1], strides = [1, 1, 1]} : vector<1x32x1xf32> to vector<1x2x1xf32>
    %cst_21 = arith.constant dense<0.000000e+00> : vector<1x1xf32>
    %97 = vector.multi_reduction <add>, %96, %cst_21 [1] : vector<1x2x1xf32> to vector<1x1xf32>
    %98 = vector.shape_cast %97 : vector<1x1xf32> to vector<1x1x1xf32>
    %99 = vector.shape_cast %98 : vector<1x1x1xf32> to vector<1x1x1xf32>
    %100 = vector.broadcast %99 : vector<1x1x1xf32> to vector<1x2x1xf32>
    %101 = vector.extract_strided_slice %90 {offsets = [0, 4, 0], sizes = [1, 2, 1], strides = [1, 1, 1]} : vector<1x32x1xf32> to vector<1x2x1xf32>
    %cst_22 = arith.constant dense<0.000000e+00> : vector<1x1xf32>
    %102 = vector.multi_reduction <add>, %101, %cst_22 [1] : vector<1x2x1xf32> to vector<1x1xf32>
    %103 = vector.shape_cast %102 : vector<1x1xf32> to vector<1x1x1xf32>
    %104 = vector.shape_cast %103 : vector<1x1x1xf32> to vector<1x1x1xf32>
    %105 = vector.broadcast %104 : vector<1x1x1xf32> to vector<1x2x1xf32>
    %106 = vector.extract_strided_slice %90 {offsets = [0, 6, 0], sizes = [1, 2, 1], strides = [1, 1, 1]} : vector<1x32x1xf32> to vector<1x2x1xf32>
    %cst_23 = arith.constant dense<0.000000e+00> : vector<1x1xf32>
    %107 = vector.multi_reduction <add>, %106, %cst_23 [1] : vector<1x2x1xf32> to vector<1x1xf32>
    %108 = vector.shape_cast %107 : vector<1x1xf32> to vector<1x1x1xf32>
    %109 = vector.shape_cast %108 : vector<1x1x1xf32> to vector<1x1x1xf32>
    %110 = vector.broadcast %109 : vector<1x1x1xf32> to vector<1x2x1xf32>
    %111 = vector.extract_strided_slice %90 {offsets = [0, 8, 0], sizes = [1, 2, 1], strides = [1, 1, 1]} : vector<1x32x1xf32> to vector<1x2x1xf32>
    %cst_24 = arith.constant dense<0.000000e+00> : vector<1x1xf32>
    %112 = vector.multi_reduction <add>, %111, %cst_24 [1] : vector<1x2x1xf32> to vector<1x1xf32>
    %113 = vector.shape_cast %112 : vector<1x1xf32> to vector<1x1x1xf32>
    %114 = vector.shape_cast %113 : vector<1x1x1xf32> to vector<1x1x1xf32>
    %115 = vector.broadcast %114 : vector<1x1x1xf32> to vector<1x2x1xf32>
    %116 = vector.extract_strided_slice %90 {offsets = [0, 10, 0], sizes = [1, 2, 1], strides = [1, 1, 1]} : vector<1x32x1xf32> to vector<1x2x1xf32>
    %cst_25 = arith.constant dense<0.000000e+00> : vector<1x1xf32>
    %117 = vector.multi_reduction <add>, %116, %cst_25 [1] : vector<1x2x1xf32> to vector<1x1xf32>
    %118 = vector.shape_cast %117 : vector<1x1xf32> to vector<1x1x1xf32>
    %119 = vector.shape_cast %118 : vector<1x1x1xf32> to vector<1x1x1xf32>
    %120 = vector.broadcast %119 : vector<1x1x1xf32> to vector<1x2x1xf32>
    %121 = vector.extract_strided_slice %90 {offsets = [0, 12, 0], sizes = [1, 2, 1], strides = [1, 1, 1]} : vector<1x32x1xf32> to vector<1x2x1xf32>
    %cst_26 = arith.constant dense<0.000000e+00> : vector<1x1xf32>
    %122 = vector.multi_reduction <add>, %121, %cst_26 [1] : vector<1x2x1xf32> to vector<1x1xf32>
    %123 = vector.shape_cast %122 : vector<1x1xf32> to vector<1x1x1xf32>
    %124 = vector.shape_cast %123 : vector<1x1x1xf32> to vector<1x1x1xf32>
    %125 = vector.broadcast %124 : vector<1x1x1xf32> to vector<1x2x1xf32>
    %126 = vector.extract_strided_slice %90 {offsets = [0, 14, 0], sizes = [1, 2, 1], strides = [1, 1, 1]} : vector<1x32x1xf32> to vector<1x2x1xf32>
    %cst_27 = arith.constant dense<0.000000e+00> : vector<1x1xf32>
    %127 = vector.multi_reduction <add>, %126, %cst_27 [1] : vector<1x2x1xf32> to vector<1x1xf32>
    %128 = vector.shape_cast %127 : vector<1x1xf32> to vector<1x1x1xf32>
    %129 = vector.shape_cast %128 : vector<1x1x1xf32> to vector<1x1x1xf32>
    %130 = vector.broadcast %129 : vector<1x1x1xf32> to vector<1x2x1xf32>
    %131 = vector.extract_strided_slice %90 {offsets = [0, 16, 0], sizes = [1, 2, 1], strides = [1, 1, 1]} : vector<1x32x1xf32> to vector<1x2x1xf32>
    %cst_28 = arith.constant dense<0.000000e+00> : vector<1x1xf32>
    %132 = vector.multi_reduction <add>, %131, %cst_28 [1] : vector<1x2x1xf32> to vector<1x1xf32>
    %133 = vector.shape_cast %132 : vector<1x1xf32> to vector<1x1x1xf32>
    %134 = vector.shape_cast %133 : vector<1x1x1xf32> to vector<1x1x1xf32>
    %135 = vector.broadcast %134 : vector<1x1x1xf32> to vector<1x2x1xf32>
    %136 = vector.extract_strided_slice %90 {offsets = [0, 18, 0], sizes = [1, 2, 1], strides = [1, 1, 1]} : vector<1x32x1xf32> to vector<1x2x1xf32>
    %cst_29 = arith.constant dense<0.000000e+00> : vector<1x1xf32>
    %137 = vector.multi_reduction <add>, %136, %cst_29 [1] : vector<1x2x1xf32> to vector<1x1xf32>
    %138 = vector.shape_cast %137 : vector<1x1xf32> to vector<1x1x1xf32>
    %139 = vector.shape_cast %138 : vector<1x1x1xf32> to vector<1x1x1xf32>
    %140 = vector.broadcast %139 : vector<1x1x1xf32> to vector<1x2x1xf32>
    %141 = vector.extract_strided_slice %90 {offsets = [0, 20, 0], sizes = [1, 2, 1], strides = [1, 1, 1]} : vector<1x32x1xf32> to vector<1x2x1xf32>
    %cst_30 = arith.constant dense<0.000000e+00> : vector<1x1xf32>
    %142 = vector.multi_reduction <add>, %141, %cst_30 [1] : vector<1x2x1xf32> to vector<1x1xf32>
    %143 = vector.shape_cast %142 : vector<1x1xf32> to vector<1x1x1xf32>
    %144 = vector.shape_cast %143 : vector<1x1x1xf32> to vector<1x1x1xf32>
    %145 = vector.broadcast %144 : vector<1x1x1xf32> to vector<1x2x1xf32>
    %146 = vector.extract_strided_slice %90 {offsets = [0, 22, 0], sizes = [1, 2, 1], strides = [1, 1, 1]} : vector<1x32x1xf32> to vector<1x2x1xf32>
    %cst_31 = arith.constant dense<0.000000e+00> : vector<1x1xf32>
    %147 = vector.multi_reduction <add>, %146, %cst_31 [1] : vector<1x2x1xf32> to vector<1x1xf32>
    %148 = vector.shape_cast %147 : vector<1x1xf32> to vector<1x1x1xf32>
    %149 = vector.shape_cast %148 : vector<1x1x1xf32> to vector<1x1x1xf32>
    %150 = vector.broadcast %149 : vector<1x1x1xf32> to vector<1x2x1xf32>
    %151 = vector.extract_strided_slice %90 {offsets = [0, 24, 0], sizes = [1, 2, 1], strides = [1, 1, 1]} : vector<1x32x1xf32> to vector<1x2x1xf32>
    %cst_32 = arith.constant dense<0.000000e+00> : vector<1x1xf32>
    %152 = vector.multi_reduction <add>, %151, %cst_32 [1] : vector<1x2x1xf32> to vector<1x1xf32>
    %153 = vector.shape_cast %152 : vector<1x1xf32> to vector<1x1x1xf32>
    %154 = vector.shape_cast %153 : vector<1x1x1xf32> to vector<1x1x1xf32>
    %155 = vector.broadcast %154 : vector<1x1x1xf32> to vector<1x2x1xf32>
    %156 = vector.extract_strided_slice %90 {offsets = [0, 26, 0], sizes = [1, 2, 1], strides = [1, 1, 1]} : vector<1x32x1xf32> to vector<1x2x1xf32>
    %cst_33 = arith.constant dense<0.000000e+00> : vector<1x1xf32>
    %157 = vector.multi_reduction <add>, %156, %cst_33 [1] : vector<1x2x1xf32> to vector<1x1xf32>
    %158 = vector.shape_cast %157 : vector<1x1xf32> to vector<1x1x1xf32>
    %159 = vector.shape_cast %158 : vector<1x1x1xf32> to vector<1x1x1xf32>
    %160 = vector.broadcast %159 : vector<1x1x1xf32> to vector<1x2x1xf32>
    %161 = vector.extract_strided_slice %90 {offsets = [0, 28, 0], sizes = [1, 2, 1], strides = [1, 1, 1]} : vector<1x32x1xf32> to vector<1x2x1xf32>
    %cst_34 = arith.constant dense<0.000000e+00> : vector<1x1xf32>
    %162 = vector.multi_reduction <add>, %161, %cst_34 [1] : vector<1x2x1xf32> to vector<1x1xf32>
    %163 = vector.shape_cast %162 : vector<1x1xf32> to vector<1x1x1xf32>
    %164 = vector.shape_cast %163 : vector<1x1x1xf32> to vector<1x1x1xf32>
    %165 = vector.broadcast %164 : vector<1x1x1xf32> to vector<1x2x1xf32>
    %166 = vector.extract_strided_slice %90 {offsets = [0, 30, 0], sizes = [1, 2, 1], strides = [1, 1, 1]} : vector<1x32x1xf32> to vector<1x2x1xf32>
    %cst_35 = arith.constant dense<0.000000e+00> : vector<1x1xf32>
    %167 = vector.multi_reduction <add>, %166, %cst_35 [1] : vector<1x2x1xf32> to vector<1x1xf32>
    %168 = vector.shape_cast %167 : vector<1x1xf32> to vector<1x1x1xf32>
    %169 = vector.shape_cast %168 : vector<1x1x1xf32> to vector<1x1x1xf32>
    %170 = vector.broadcast %169 : vector<1x1x1xf32> to vector<1x2x1xf32>
    %171 = tpu.concatenate %95, %100, %105, %110, %115, %120, %125, %130, %135, %140, %145, %150, %155, %160, %165, %170 in 1 : vector<1x2x1xf32>, vector<1x2x1xf32>, vector<1x2x1xf32>, vector<1x2x1xf32>, vector<1x2x1xf32>, vector<1x2x1xf32>, vector<1x2x1xf32>, vector<1x2x1xf32>, vector<1x2x1xf32>, vector<1x2x1xf32>, vector<1x2x1xf32>, vector<1x2x1xf32>, vector<1x2x1xf32>, vector<1x2x1xf32>, vector<1x2x1xf32>, vector<1x2x1xf32> -> vector<1x32x1xf32>
    %cst_36 = arith.constant 0.00195694715 : f32
    %172 = vector.broadcast %cst_36 : f32 to vector<1x32x1xf32>
    %173 = arith.mulf %171, %172 : vector<1x32x1xf32>
    %174 = math.sqrt %173 : vector<1x32x1xf32>
    %cst_37 = arith.constant 1.000000e-10 : f32
    %175 = vector.broadcast %cst_37 : f32 to vector<1x32x1xf32>
    %176 = arith.addf %174, %175 : vector<1x32x1xf32>
    %cst_38 = arith.constant 1.000000e+00 : f32
    %177 = vector.broadcast %cst_38 : f32 to vector<1x32x1xf32>
    %178 = arith.divf %177, %176 : vector<1x32x1xf32>
    %c0_39 = arith.constant 0 : index
    %c0_40 = arith.constant 0 : index
    %179 = vector.load %arg2[%c0_39, %c0_40] : memref<32x1xf32, #tpu.memory_space<vmem>>, vector<32x1xf32>
    %180 = vector.shape_cast %179 : vector<32x1xf32> to vector<1x32x1xf32>
    %c0_41 = arith.constant 0 : index
    %c0_42 = arith.constant 0 : index
    %181 = vector.load %arg3[%c0_41, %c0_42] : memref<32x1xf32, #tpu.memory_space<vmem>>, vector<32x1xf32>
    %182 = vector.shape_cast %181 : vector<32x1xf32> to vector<1x32x1xf32>
    %c0_43 = arith.constant 0 : index
    %c0_44 = arith.constant 0 : index
    %183 = vector.load %arg4[%c0_43, %c0_44] : memref<32x1xf32, #tpu.memory_space<vmem>>, vector<32x1xf32>
    %184 = vector.shape_cast %183 : vector<32x1xf32> to vector<1x32x1xf32>
    %185 = arith.mulf %180, %178 : vector<1x32x1xf32>
    %186 = vector.broadcast %185 : vector<1x32x1xf32> to vector<1x32x256xf32>
    %187 = arith.mulf %87, %186 : vector<1x32x256xf32>
    %188 = vector.broadcast %182 : vector<1x32x1xf32> to vector<1x32x256xf32>
    %189 = arith.addf %187, %188 : vector<1x32x256xf32>
    %190 = vector.broadcast %184 : vector<1x32x1xf32> to vector<1x32x256xf32>
    %191 = arith.mulf %189, %190 : vector<1x32x256xf32>
    %cst_45 = arith.constant 0.000000e+00 : f32
    %192 = vector.broadcast %cst_45 : f32 to vector<1x32x256xf32>
    %193 = arith.cmpf oge, %191, %192 : vector<1x32x256xf32>
    %cst_46 = arith.constant 0.000000e+00 : f32
    %194 = vector.broadcast %cst_46 : f32 to vector<1x32x256xf32>
    %195 = arith.select %193, %189, %194 : vector<1x32x256xi1>, vector<1x32x256xf32>
    %cst_47 = arith.constant 0.000000e+00 : f32
    %196 = vector.broadcast %cst_47 : f32 to vector<1x32x256xf32>
    %197 = arith.select %193, %196, %189 : vector<1x32x256xi1>, vector<1x32x256xf32>
    %198 = vector.extract_strided_slice %197 {offsets = [0, 16, 0], sizes = [1, 16, 256], strides = [1, 1, 1]} : vector<1x32x256xf32> to vector<1x16x256xf32>
    %199 = vector.extract_strided_slice %197 {offsets = [0, 0, 0], sizes = [1, 16, 256], strides = [1, 1, 1]} : vector<1x32x256xf32> to vector<1x16x256xf32>
    %200 = tpu.concatenate %198, %199 in 1 : vector<1x16x256xf32>, vector<1x16x256xf32> -> vector<1x32x256xf32>
    %201 = arith.addf %195, %200 : vector<1x32x256xf32>
    %c0_48 = arith.constant 0 : index
    %c0_49 = arith.constant 0 : index
    %c0_50 = arith.constant 0 : index
    %202 = vector.load %arg5[%c0_48, %c0_49, %c0_50] : memref<1x32x256xf32, #tpu.memory_space<vmem>>, vector<1x32x256xf32>
    tpu.vector_store %arg5[%c0_48, %c0_49, %c0_50], %201 {strides = array<i32>} : memref<1x32x256xf32, #tpu.memory_space<vmem>>, vector<1x32x256xf32>,
    return
  }
  func.func @transform_0(%arg0: i32) -> (i32, i32, i32) {
    %c0_i32 = arith.constant 0 : i32
    %c0_i32_0 = arith.constant 0 : i32
    %c0_i32_1 = arith.constant 0 : i32
    return %arg0, %c0_i32, %c0_i32_0 : i32, i32, i32
  }
  func.func @transform_1(%arg0: i32) -> (i32, i32) {
    %c0_i32 = arith.constant 0 : i32
    %c0_i32_0 = arith.constant 0 : i32
    %c0_i32_1 = arith.constant 0 : i32
    return %c0_i32, %c0_i32_0 : i32, i32
  }
  func.func @transform_2(%arg0: i32) -> (i32, i32) {
    %c0_i32 = arith.constant 0 : i32
    %c0_i32_0 = arith.constant 0 : i32
    %c0_i32_1 = arith.constant 0 : i32
    return %c0_i32, %c0_i32_0 : i32, i32
  }
  func.func @transform_3(%arg0: i32) -> (i32, i32) {
    %c0_i32 = arith.constant 0 : i32
    %c0_i32_0 = arith.constant 0 : i32
    %c0_i32_1 = arith.constant 0 : i32
    return %c0_i32, %c0_i32_0 : i32, i32
  }
  func.func @transform_4(%arg0: i32) -> (i32, i32, i32) {
    %c0_i32 = arith.constant 0 : i32
    %c0_i32_0 = arith.constant 0 : i32
    %c0_i32_1 = arith.constant 0 : i32
    return %arg0, %c0_i32, %c0_i32_0 : i32, i32, i32
  }
}

</mosaic_0001>

<bundles_post_ra>
// kernel: tpu_custom_call.1
= control target key start
LH: loop header
LB: loop body
LE: loop exit
PB: predicated region body
PF: predicated region fallthrough
CT: control target
= control target key end

     0   :  { %9 = vsyncpa [#allocation3], 0  ;;  %s1430_s0 = inlined_call_operand.hbm [shape: f32[2,32,256], index: 0, kind: input, shape index: {}]   ;;  %s1431_s1 = inlined_call_operand.vmem [shape: f32[32,1], index: 1, kind: input, shape index: {}]   ;;  %s1432_s2 = inlined_call_operand.vmem [shape: f32[32,1], index: 2, kind: input, shape index: {}]   ;;  %s1433_s3 = inlined_call_operand.vmem [shape: f32[32,1], index: 3, kind: input, shape index: {}]   ;;  %s1434_s4 = inlined_call_operand.hbm [shape: f32[2,32,256], index: 4, kind: output, shape index: {}]  }
   0x1   :  { %11 = vsyncpa [#allocation3 + $0x1], 0 }
   0x2   :  { %12 = vsyncpa [#allocation4], 0 }
   0x3   :  { %14 = vsyncpa [#allocation4 + $0x1], 0  ;;  %s1081_s15 = smov 0   ;;  %s1083_s16 = smov 0  }
   0x4   :  { %s1085_s17 = smov 0   ;;  %s1087_s18 = smov 0  }
   0x5 LB: > { %s1102_s19 = sadd.s32 4294967295, %s1047_s18   ;;  %s866_s20 = sadd.s32 4294967294, %s1047_s18   ;;  %s1047_s18 = sphi %s1087_s18, %s1447_s18   ;;  %s1043_s17 = sphi %s1085_s17, %s1446_s17   ;;  %s1039_s16 = sphi %s1083_s16, %s1445_s16   ;;  %s1035_s15 = sphi %s1081_s15, %s1444_s15  }
   0x6   : > { %s1106_s21 = sadd.s32 1, %s1047_s18   ;;  %s27_s22 = sadd.s32 1, %s1043_s17 }
   0x7   : > { %s24_s23 = ssub.s32 %s1047_s18, %s1106_s21  ;;  %p34_p0 = scmp.ne.s32.totalorder %s1043_s17, %s1039_s16 }
   0x8   : > { %p25_p1 = scmp.eq.s32.totalorder %s24_s23, 0  ;;  %p35_p2 = scmp.eq.s32.totalorder %s1047_s18, 0 }
   0x9   : > { %p40_p3 = scmp.ne.s32.totalorder %s1039_s16, %s1035_s15  ;;  %p41_p4 = scmp.eq.s32.totalorder %s1102_s19, 0 }
   0xa   : > { %s1118_s24 = scalar_select %p25_p1, %s1043_s17, %s27_s22  }
   0xb   : > { %p1120_p5 = por %p35_p2, %p34_p0  ;;  %p1124_p6 = por %p41_p4, %p40_p3 }
   0xc   : > { %p127_p7 = scmp.eq.s32.totalorder %s1102_s19, 1  ;;  %p133_p8 = scmp.eq.s32.totalorder %s866_s20, 1 }
   0xd   : > { %p894_p10 = scmp.lt.s32.totalorder %s1047_s18, 2  ;;  %s162_s29 = sand.u32 1, %s1043_s17  }
   0xe   : > { %p1131_p11 = por %p127_p7, %p34_p0  ;;  %p1135_p12 = por %p133_p8, %p40_p3 }
   0xf   : > { %s880_s30 = sshll.u32 %s1047_s18, 10  ;;  %s869_s5 = sshll.u32 %s162_s29, 6 }
  0x10   : > { %s1438_s27 = scalar_select %p1131_p11, 1, 0 }
  0x11   : > { %s1439_s28 = scalar_select %p1135_p12, 1, 0 }
  0x12   : > { %s1144_s8 = scalar_lea.hbm %s1430_s0, %s880_s30  ;;  %s166_s9 = scalar_lea.vmem [#allocation2], %s869_s5 }
  0x13   : > { %s173_s10 = sshll.u32 %s166_s9, 4  ;;  %p1148_p13 = pnand %p894_p10, %p1120_p5  ;;  %s1152_s10 = int_to_ptr.vmem [resolvable:$true] %s173_s10 }
  0x14   : > { %s1154_s12 = scalar_lea.sflag [#allocation3], %s162_s29  ;;  %s951_s13 = scalar_lea.hbm %s1144_s8, 1024 }
  0x15   : > { %p952_p0 = scmp.ne.s32.totalorder %s1144_s8, %s951_s13  ;;  %p953_p1 = pneg %p1148_p13 }
  0x16   : > { %s956_s22 = scalar_lea.hbm %s1430_s0, 2048  ;;  %p957_p4 = scmp.lt.u32.totalorder %s1144_s8, %s1430_s0 }
  0x17   : > { %p954_p2 = pnand %p953_p1, %p952_p0  ;;  %p958_p5 = scmp.lt.u32.totalorder %s956_s22, %s951_s13 }
  0x18   : > { %p960_p8 = scmp.lt.u32.totalorder %s951_s13, %s1144_s8 }
  0x19   : > { %p955_p3 = pneg %p954_p2  ;;  %p959_p7 = por %p958_p5, %p957_p4 }
  0x1b   : > { %p961_p10 = por %p960_p8, %p959_p7 }
  0x1d   : > { %p962_p9 = pnand %p961_p10, %p955_p3 }
  0x1f   : > { %965 = shalt.err (!%p962_p9)
}
  0x20   : > { %s966_s29 = scalar_lea.vmem %s1152_s10, 1024  ;;  %s1049_s30 = smov [#allocation2]  }
  0x21   : > { %p967_p0 = scmp.ne.s32.totalorder %s1152_s10, %s966_s29  ;;  %s971_s5 = sshll.u32 %s1049_s30, 4  ;;  %s972_s5 = int_to_ptr.vmem [resolvable:$false] %s971_s5 }
  0x22   : > { %s973_s6 = scalar_lea.vmem %s972_s5, 2048  ;;  %p974_p11 = scmp.lt.s32.totalorder %s1152_s10, %s972_s5 }
  0x23   : > { %p969_p2 = pnand %p967_p0, %p953_p1  ;;  %p975_p4 = scmp.lt.s32.totalorder %s973_s6, %s966_s29 }
  0x25   : > { %p970_p12 = pneg %p969_p2  ;;  %p976_p5 = por %p975_p4, %p974_p11 }
  0x27   : > { %p977_p7 = pnand %p976_p5, %p970_p12 }
  0x29   : > { %980 = shalt.err (!%p977_p7)
}
  0x2a   : > { %s1050_s7 = smov 256   ;;  %s1051_s9 = smov 16  }
  0x2b   : > { %889 = dma.hbm_to_vmem [thread:$0]  (!%p1148_p13), %s1144_s8, 1024, %s1152_s10, %s1154_s12, %s1050_s7, %s1050_s7, %s1051_s9  }
  0x2c   : > { %p872_p9 = scmp.ge.s32.totalorder %s1047_s18, 1  ;;  %p181_p1 = scmp.lt.s32.totalorder %s1047_s18, 3 }
  0x2e   : > { %p182_p3 = pnand %p872_p9, %p181_p1 }
  0x2f   : > { %s1185_s13 = sand.u32 (!%p182_p3), 1, %s1039_s16  }
  0x30   : > { %185 = sbr.rel (%p182_p3) target bundleno = 741 (0x2e5), region = 36  ;;  %s873_s14 = sshll.u32 (!%p182_p3), %s1185_s13, 6 }
  0x31   : > { %s188_s20 = scalar_lea.sflag (!%p182_p3), [#allocation3], %s1185_s13  ;;  %s191_s22 = scalar_lea.vmem (!%p182_p3), [#allocation2], %s873_s14 }
  0x37   : > { %1026 = dma.done.wait (%p1124_p6), %s188_s20, 1024  }
  0x38   : > { %1028 = vsyncadd (%p1124_p6), %s188_s20, 4294966272  ;;  %v1195_v0 = vld [vmem:[%s191_s22 + $0x20] sm:$0xff]  ;;  %v1197_v1 = vld [vmem:[%s191_s22 + $0x28] sm:$0xff]  ;;  %v1052_v12 = vmov 0   ;;  %vm236_vm0 = vcmask 1041408   ;;  %vm378_vm1 = vcmask 1043456  }
  0x39   : > { %v1199_v2 = vld [vmem:[%s191_s22] sm:$0xff]  ;;  %v230_v3 = vadd.f32 %v1197_v1, %v1195_v0  ;;  %v1203_v4 = vld [vmem:[%s191_s22 + $0x8] sm:$0xff]  ;;  %v1205_v5 = vld [vmem:[%s191_s22 + $0x30] sm:$0xff]  ;;  %933 = vset.pattern.permute.xlu0 %v1052_v12  ;;  %934 = vset.pattern.permute.xlu1 %v1052_v12  ;;  %vm380_vm2 = vcmask 1045504   ;;  %s881_s5 = sshll.u32 %s1102_s19, 10  ;;  %s215_s6 = scalar_lea.vmem [#allocation5], %s873_s14 }
  0x3a   : > { %v1207_v6 = vld [vmem:[%s191_s22 + $0x38] sm:$0xff]  ;;  %v224_v7 = vadd.f32 %v1203_v4, %v1199_v2  ;;  %v1211_v8 = vld [vmem:[%s191_s22 + $0x10] sm:$0xff]  ;;  %s793_s7 = sshll.u32 %s215_s6, 4  ;;  %s1384_s19 = scalar_lea.hbm %s1434_s4, %s881_s5  ;;  %s1386_s7 = int_to_ptr.vmem [resolvable:$true] %s793_s7 }
  0x3b   : > { %v1213_v9 = vld [vmem:[%s191_s22 + $0x18] sm:$0xff]  ;;  %231 = vadd.xlane.f32.xlu1 %v230_v3  ;;  %v233_v10 = vadd.f32 %v1207_v6, %v1205_v5  ;;  %s780_s14 = scalar_lea.sflag [#allocation4], %s1185_s13  ;;  %s981_s22 = scalar_lea.vmem %s1386_s7, 1024 }
  0x3c   : > { %225 = vadd.xlane.f32.xlu0 %v224_v7  ;;  %v227_v11 = vadd.f32 %v1213_v9, %v1211_v8  ;;  %p982_p6 = scmp.ne.s32.totalorder %s1386_s7, %s981_s22  ;;  %p1441_p11 = scmp.ne.s32.totalorder %s1438_s27, 0 }
  0x3d   : > { %s1053_s26 = smov [#allocation5]  }
  0x3e   : > { %p983_p12 = pnand %p982_p6, %p1441_p11  ;;  %s985_s8 = sshll.u32 %s1053_s26, 4  ;;  %s986_s8 = int_to_ptr.vmem [resolvable:$false] %s985_s8 }
  0x3f   : > { %234 = vadd.xlane.f32.xlu1 %v233_v10  ;;  %s987_s10 = scalar_lea.vmem %s986_s8, 2048  ;;  %p988_p8 = scmp.lt.s32.totalorder %s1386_s7, %s986_s8 }
  0x40   : > { %228 = vadd.xlane.f32.xlu0 %v227_v11  ;;  %p984_p13 = pneg %p983_p12  ;;  %p989_p10 = scmp.lt.s32.totalorder %s987_s10, %s981_s22 }
  0x42   : > { %p990_p0 = por %p989_p10, %p988_p8 }
  0x44   : > { %p991_p2 = pnand %p990_p0, %p984_p13 }
  0xc8   : > { %v232_v13 = vpop.xlane.xlu1 %231 }
  0xc9   : > { %v307_v14 = vsel %vm236_vm0, %v232_v13, 0.0  ;;  %v315_v15 = vrot.slane %v232_v13, 2  ;;  %v324_v16 = vrot.slane %v232_v13, 4  ;;  %v333_v17 = vrot.slane %v232_v13, 6  ;;  %v226_v18 = vpop.xlane.xlu0 %225 }
  0xca   : > { %v308_v19 = vrot.slane %v307_v14, 4  ;;  %v237_v20 = vsel %vm236_vm0, %v226_v18, 0.0  ;;  %v245_v21 = vrot.slane %v226_v18, 2  ;;  %v254_v22 = vrot.slane %v226_v18, 4 }
  0xcb   : > { %v317_v23 = vsel %vm236_vm0, %v315_v15, 0.0  ;;  %v326_v24 = vsel %vm236_vm0, %v324_v16, 0.0  ;;  %v335_v25 = vsel %vm236_vm0, %v333_v17, 0.0  ;;  %v238_v26 = vrot.slane %v237_v20, 4 }
  0xcc   : > { %v309_v27 = vadd.f32 %v308_v19, %v307_v14  ;;  %v318_v28 = vrot.slane %v317_v23, 4  ;;  %v327_v29 = vrot.slane %v326_v24, 4  ;;  %v336_v30 = vrot.slane %v335_v25, 4  ;;  %v235_v50 = vpop.xlane.xlu1 %234 }
  0xcd   : > { %v239_v31 = vadd.f32 %v238_v26, %v237_v20  ;;  %v247_v32 = vsel %vm236_vm0, %v245_v21, 0.0  ;;  %v256_v33 = vsel %vm236_vm0, %v254_v22, 0.0  ;;  %v263_v34 = vrot.slane %v226_v18, 6  ;;  %v229_v60 = vpop.xlane.xlu0 %228 }
  0xce   : > { %v310_v35 = vrot.slane %v309_v27, 2  ;;  %v319_v36 = vadd.f32 %v318_v28, %v317_v23  ;;  %v328_v37 = vadd.f32 %v327_v29, %v326_v24  ;;  %v248_v39 = vrot.slane %v247_v32, 4 }
  0xcf   : > { %v240_v38 = vrot.slane %v239_v31, 2  ;;  %v257_v40 = vrot.slane %v256_v33, 4  ;;  %v265_v41 = vsel %vm236_vm0, %v263_v34, 0.0  ;;  %v1227_v45 = vadd.f32 %v336_v30, %v335_v25 }
  0xd0   : > { %v311_v42 = vadd.f32 %v310_v35, %v309_v27  ;;  %v320_v43 = vrot.slane %v319_v36, 2  ;;  %v329_v44 = vrot.slane %v328_v37, 2  ;;  %v249_v47 = vadd.f32 %v248_v39, %v247_v32 }
  0xd1   : > { %v241_v46 = vadd.f32 %v240_v38, %v239_v31  ;;  %v258_v48 = vadd.f32 %v257_v40, %v256_v33  ;;  %v266_v49 = vrot.slane %v265_v41, 4  ;;  %v342_v54 = vsel %vm236_vm0, %v235_v50, 0.0 }
  0xd2   : > { %v312_v51 = vrot.slane %v311_v42, 1  ;;  %v321_v52 = vadd.f32 %v320_v43, %v319_v36  ;;  %v1229_v53 = vadd.f32 %v329_v44, %v328_v37  ;;  %v250_v56 = vrot.slane %v249_v47, 2 }
  0xd3   : > { %v242_v55 = vrot.slane %v241_v46, 1  ;;  %v259_v57 = vrot.slane %v258_v48, 2  ;;  %v338_v58 = vrot.slane %v1227_v45, 2  ;;  %v343_v59 = vrot.slane %v342_v54, 4 }
  0xd4   : > { %v1233_v61 = vadd.f32 %v312_v51, %v311_v42  ;;  %v322_v62 = vrot.slane %v321_v52, 1  ;;  %v251_v63 = vadd.f32 %v250_v56, %v249_v47  ;;  %v267_v3 = vadd.f32 %v266_v49, %v265_v41 }
  0xd5   : > { %v331_v7 = vrot.slane %v1229_v53, 1  ;;  %v344_v10 = vadd.f32 %v343_v59, %v342_v54  ;;  %v350_v11 = vrot.slane %v235_v50, 2  ;;  %v359_v12 = vrot.slane %v235_v50, 4 }
  0xd6   : > { %v243_v13 = vadd.f32 %v242_v55, %v241_v46  ;;  %v260_v14 = vadd.f32 %v259_v57, %v258_v48  ;;  %v368_v15 = vrot.slane %v235_v50, 6  ;;  %v272_v16 = vsel %vm236_vm0, %v229_v60, 0.0 }
  0xd7   : > { %v345_v17 = vrot.slane %v344_v10, 2  ;;  %v352_v18 = vsel %vm236_vm0, %v350_v11, 0.0  ;;  %v361_v19 = vsel %vm236_vm0, %v359_v12, 0.0  ;;  %v273_v20 = vrot.slane %v272_v16, 4 }
  0xd8   : > { %v252_v21 = vrot.slane %v251_v63, 1  ;;  %v353_v22 = vrot.slane %v352_v18, 4  ;;  %v362_v23 = vrot.slane %v361_v19, 4  ;;  %v370_v24 = vsel %vm236_vm0, %v368_v15, 0.0 }
  0xd9   : > { %v346_v25 = vadd.f32 %v345_v17, %v344_v10  ;;  %v371_v26 = vrot.slane %v370_v24, 4  ;;  %v274_v27 = vadd.f32 %v273_v20, %v272_v16  ;;  %v280_v28 = vrot.slane %v229_v60, 2 }
  0xda   : > { %v354_v29 = vadd.f32 %v353_v22, %v352_v18  ;;  %v363_v30 = vadd.f32 %v362_v23, %v361_v19  ;;  %v289_v31 = vrot.slane %v229_v60, 4  ;;  %v298_v32 = vrot.slane %v229_v60, 6 }
  0xdb   : > { %v261_v33 = vrot.slane %v260_v14, 1  ;;  %v268_v34 = vrot.slane %v267_v3, 2  ;;  %v275_v35 = vrot.slane %v274_v27, 2  ;;  %v282_v36 = vsel %vm236_vm0, %v280_v28, 0.0 }
  0xdc   : > { %v355_v37 = vrot.slane %v354_v29, 2  ;;  %v364_v38 = vrot.slane %v363_v30, 2  ;;  %v283_v39 = vrot.slane %v282_v36, 4  ;;  %v291_v40 = vsel %vm236_vm0, %v289_v31, 0.0 }
  0xdd   : > { %v253_v41 = vadd.f32 %v252_v21, %v251_v63  ;;  %v347_v42 = vrot.slane %v346_v25, 1  ;;  %v276_v43 = vadd.f32 %v275_v35, %v274_v27  ;;  %v292_v44 = vrot.slane %v291_v40, 4 }
  0xde   : > { %v356_v46 = vadd.f32 %v355_v37, %v354_v29  ;;  %v372_v47 = vadd.f32 %v371_v26, %v370_v24  ;;  %v284_v48 = vadd.f32 %v283_v39, %v282_v36  ;;  %v300_v49 = vsel %vm236_vm0, %v298_v32, 0.0 }
  0xdf   : > { %v323_v50 = vadd.f32 %v322_v62, %v321_v52  ;;  %v293_v51 = vadd.f32 %v292_v44, %v291_v40  ;;  %v301_v54 = vrot.slane %v300_v49, 4  ;;  %v262_v55 = vadd.f32 %v261_v33, %v260_v14 }
  0xe0   : > { %v365_v56 = vadd.f32 %v364_v38, %v363_v30  ;;  %v277_v57 = vrot.slane %v276_v43, 1  ;;  %v285_v59 = vrot.slane %v284_v48, 2  ;;  %v269_v60 = vadd.f32 %v268_v34, %v267_v3 }
  0xe1   : > { %v357_v10 = vrot.slane %v356_v46, 1  ;;  %v294_v11 = vrot.slane %v293_v51, 2  ;;  %v302_v12 = vadd.f32 %v301_v54, %v300_v49  ;;  %v377_v63 = vsel %vm236_vm0, %v243_v13, %v253_v41 }
  0xe2   : > { %v348_v15 = vadd.f32 %v347_v42, %v346_v25  ;;  %v373_v16 = vrot.slane %v372_v47, 2  ;;  %v286_v17 = vadd.f32 %v285_v59, %v284_v48  ;;  %v270_v18 = vrot.slane %v269_v60, 1 }
  0xe3   : > { %v295_v19 = vadd.f32 %v294_v11, %v293_v51  ;;  %v303_v20 = vrot.slane %v302_v12, 2  ;;  %v379_v52 = vsel %vm378_vm1, %v377_v63, %v262_v55  ;;  %v339_v62 = vadd.f32 %v338_v58, %v1227_v45 }
  0xe4   : > { %v366_v14 = vrot.slane %v365_v56, 1  ;;  %v278_v21 = vadd.f32 %v277_v57, %v276_v43  ;;  %v287_v3 = vrot.slane %v286_v17, 1  ;;  %v271_v22 = vadd.f32 %v270_v18, %v269_v60  ;;  %v645_v18 = vld [vmem:[%s1432_s2 + $0x10] sm:$0xff] }
  0xe5   : > { %v358_v23 = vadd.f32 %v357_v10, %v356_v46  ;;  %v296_v24 = vrot.slane %v295_v19, 1  ;;  %v304_v26 = vadd.f32 %v303_v20, %v302_v12  ;;  %v340_v13 = vrot.slane %v339_v62, 1  ;;  %v647_v20 = vld [vmem:[%s1433_s3] sm:$0xff] }
  0xe6   : > { %v288_v25 = vadd.f32 %v287_v3, %v286_v17  ;;  %v381_v27 = vsel %vm380_vm2, %v379_v52, %v271_v22  ;;  %v332_v28 = vadd.f32 %v331_v7, %v1229_v53  ;;  %v374_v29 = vadd.f32 %v373_v16, %v372_v47  ;;  %v644_v17 = vld [vmem:[%s1432_s2 + $0x8] sm:$0xff] }
  0xe7   : > { %v391_v30 = vmul.f32 0.001953125, %v381_v27  ;;  %v297_v31 = vadd.f32 %v296_v24, %v295_v19  ;;  %v305_v32 = vrot.slane %v304_v26, 1  ;;  %v385_v45 = vsel %vm236_vm0, %v1233_v61, %v323_v50  ;;  %v648_v19 = vld [vmem:[%s1433_s3 + $0x8] sm:$0xff] }
  0xe8   : > { %v382_v58 = vsel %vm236_vm0, %v278_v21, %v288_v25  ;;  %v341_v35 = vadd.f32 %v340_v13, %v339_v62  ;;  %v375_v36 = vrot.slane %v374_v29, 1  ;;  %v386_v37 = vsel %vm378_vm1, %v385_v45, %v332_v28 }
  0xe9   : > { %397 = vperm.xlu0 %933, %v391_v30   ;;  %v306_v33 = vadd.f32 %v305_v32, %v304_v26  ;;  %v383_v34 = vsel %vm378_vm1, %v382_v58, %v297_v31  ;;  %v367_v38 = vadd.f32 %v366_v14, %v365_v56  ;;  %v388_v7 = vsel %vm236_vm0, %v348_v15, %v358_v23 }
  0xea   : > { %v387_v40 = vsel %vm380_vm2, %v386_v37, %v341_v35  ;;  %v376_v41 = vadd.f32 %v375_v36, %v374_v29 }
  0xeb   : > { %v384_v53 = vsel %vm380_vm2, %v383_v34, %v306_v33  ;;  %v389_v61 = vsel %vm378_vm1, %v388_v7, %v367_v38  ;;  %v393_v42 = vmul.f32 0.001953125, %v387_v40 }
  0xec   : > { %v392_v39 = vmul.f32 0.001953125, %v384_v53  ;;  %v390_v43 = vsel %vm380_vm2, %v389_v61, %v376_v41 }
  0xed   : > { %v394_v44 = vmul.f32 0.001953125, %v390_v43 }
  0xee   : > { %402 = vperm.xlu1 %934, %v392_v39  }
  0xf2   : > { %407 = vperm.xlu1 %934, %v393_v42  }
  0xf6   : > { %412 = vperm.xlu1 %934, %v394_v44  }
 0x168   : > { %v398_v46 = vpop.permute.xlu0 %397 }
 0x169   : > { %v1263_v47 = vsub.f32 %v1199_v2, %v398_v46  ;;  %v1266_v48 = vsub.f32 %v1203_v4, %v398_v46 }
 0x16b   : > { %v423_v49 = vmul.f32 %v1263_v47, %v1263_v47  ;;  %v424_v50 = vmul.f32 %v1266_v48, %v1266_v48 }
 0x16d   : > { %v403_v51 = vpop.permute.xlu1 %402  ;;  %v431_v54 = vadd.f32 %v424_v50, %v423_v49 }
 0x16e   : > { %v1273_v55 = vsub.f32 %v1211_v8, %v403_v51  ;;  %v1276_v56 = vsub.f32 %v1213_v9, %v403_v51 }
 0x16f   : > { %432 = vadd.xlane.f32.xlu1 %v431_v54 }
 0x170   : > { %v425_v2 = vmul.f32 %v1273_v55, %v1273_v55  ;;  %v426_v4 = vmul.f32 %v1276_v56, %v1276_v56 }
 0x171   : > { %v408_v57 = vpop.permute.xlu1 %407 }
 0x172   : > { %v1283_v59 = vsub.f32 %v1195_v0, %v408_v57  ;;  %v1286_v60 = vsub.f32 %v1197_v1, %v408_v57  ;;  %v434_v10 = vadd.f32 %v426_v4, %v425_v2 }
 0x174   : > { %435 = vadd.xlane.f32.xlu0 %v434_v10  ;;  %v427_v8 = vmul.f32 %v1283_v59, %v1283_v59  ;;  %v428_v9 = vmul.f32 %v1286_v60, %v1286_v60 }
 0x175   : > { %v413_v11 = vpop.permute.xlu1 %412 }
 0x176   : > { %v1293_v12 = vsub.f32 %v1205_v5, %v413_v11  ;;  %v1296_v63 = vsub.f32 %v1207_v6, %v413_v11  ;;  %v437_v0 = vadd.f32 %v428_v9, %v427_v8  ;;  %v643_v5 = vld [vmem:[%s1432_s2] sm:$0xff]  ;;  %v646_v6 = vld [vmem:[%s1432_s2 + $0x18] sm:$0xff] }
 0x178   : > { %438 = vadd.xlane.f32.xlu1 %v437_v0  ;;  %v429_v1 = vmul.f32 %v1293_v12, %v1293_v12  ;;  %v430_v15 = vmul.f32 %v1296_v63, %v1296_v63 }
 0x17a   : > { %v440_v16 = vadd.f32 %v430_v15, %v429_v1 }
 0x17c   : > { %441 = vadd.xlane.f32.xlu1 %v440_v16 }
 0x18a   : > { %690 = vperm.xlu0 %933, %v644_v17  }
 0x18d   : > { %685 = vperm.xlu1 %934, %v643_v5  }
 0x18e   : > { %700 = vperm.xlu0 %933, %v646_v6  }
 0x191   : > { %695 = vperm.xlu1 %934, %v645_v18  }
 0x192   : > { %718 = vperm.xlu0 %933, %v648_v19  }
 0x195   : > { %713 = vperm.xlu1 %934, %v647_v20  }
 0x1fc   : > { %v433_v52 = vpop.xlane.xlu1 %432 }
 0x1fd   : > { %v443_v62 = vsel %vm236_vm0, %v433_v52, 0.0  ;;  %v451_v14 = vrot.slane %v433_v52, 2  ;;  %v460_v21 = vrot.slane %v433_v52, 4  ;;  %v469_v3 = vrot.slane %v433_v52, 6 }
 0x1fe   : > { %v444_v22 = vrot.slane %v443_v62, 4 }
 0x1ff   : > { %v453_v23 = vsel %vm236_vm0, %v451_v14, 0.0  ;;  %v462_v24 = vsel %vm236_vm0, %v460_v21, 0.0  ;;  %v471_v26 = vsel %vm236_vm0, %v469_v3, 0.0 }
 0x200   : > { %v445_v13 = vadd.f32 %v444_v22, %v443_v62  ;;  %v454_v25 = vrot.slane %v453_v23, 4  ;;  %v463_v27 = vrot.slane %v462_v24, 4  ;;  %v472_v28 = vrot.slane %v471_v26, 4 }
 0x201   : > { %v436_v29 = vpop.xlane.xlu0 %435 }
 0x202   : > { %v446_v30 = vrot.slane %v445_v13, 2  ;;  %v455_v31 = vadd.f32 %v454_v25, %v453_v23  ;;  %v464_v32 = vadd.f32 %v463_v27, %v462_v24  ;;  %v473_v45 = vadd.f32 %v472_v28, %v471_v26 }
 0x203   : > { %v478_v58 = vsel %vm236_vm0, %v436_v29, 0.0  ;;  %v486_v33 = vrot.slane %v436_v29, 2  ;;  %v495_v34 = vrot.slane %v436_v29, 4  ;;  %v504_v35 = vrot.slane %v436_v29, 6 }
 0x204   : > { %v447_v36 = vadd.f32 %v446_v30, %v445_v13  ;;  %v456_v37 = vrot.slane %v455_v31, 2  ;;  %v465_v38 = vrot.slane %v464_v32, 2  ;;  %v474_v53 = vrot.slane %v473_v45, 2 }
 0x205   : > { %v479_v7 = vrot.slane %v478_v58, 4  ;;  %v488_v39 = vsel %vm236_vm0, %v486_v33, 0.0  ;;  %v497_v40 = vsel %vm236_vm0, %v495_v34, 0.0  ;;  %v506_v41 = vsel %vm236_vm0, %v504_v35, 0.0  ;;  %v439_v54 = vpop.xlane.xlu1 %438 }
 0x206   : > { %v448_v61 = vrot.slane %v447_v36, 1  ;;  %v457_v42 = vadd.f32 %v456_v37, %v455_v31  ;;  %v466_v43 = vadd.f32 %v465_v38, %v464_v32  ;;  %v475_v44 = vadd.f32 %v474_v53, %v473_v45 }
 0x207   : > { %v480_v46 = vadd.f32 %v479_v7, %v478_v58  ;;  %v489_v49 = vrot.slane %v488_v39, 4  ;;  %v498_v50 = vrot.slane %v497_v40, 4  ;;  %v507_v51 = vrot.slane %v506_v41, 4 }
 0x208   : > { %v449_v2 = vadd.f32 %v448_v61, %v447_v36  ;;  %v458_v4 = vrot.slane %v457_v42, 1  ;;  %v467_v57 = vrot.slane %v466_v43, 1  ;;  %v476_v10 = vrot.slane %v475_v44, 1 }
 0x209   : > { %v481_v8 = vrot.slane %v480_v46, 2  ;;  %v490_v9 = vadd.f32 %v489_v49, %v488_v39  ;;  %v499_v11 = vadd.f32 %v498_v50, %v497_v40  ;;  %v508_v0 = vadd.f32 %v507_v51, %v506_v41  ;;  %v442_v30 = vpop.xlane.xlu1 %441 }
 0x20a   : > { %v459_v1 = vadd.f32 %v458_v4, %v457_v42  ;;  %v468_v15 = vadd.f32 %v467_v57, %v466_v43  ;;  %v477_v16 = vadd.f32 %v476_v10, %v475_v44  ;;  %v513_v17 = vsel %vm236_vm0, %v439_v54, 0.0 }
 0x20b   : > { %v482_v5 = vadd.f32 %v481_v8, %v480_v46  ;;  %v491_v6 = vrot.slane %v490_v9, 2  ;;  %v500_v18 = vrot.slane %v499_v11, 2  ;;  %v509_v19 = vrot.slane %v508_v0, 2 }
 0x20c   : > { %v583_v20 = vsel %vm236_vm0, %v449_v2, %v459_v1  ;;  %v514_v52 = vrot.slane %v513_v17, 4  ;;  %v521_v62 = vrot.slane %v439_v54, 2  ;;  %v530_v14 = vrot.slane %v439_v54, 4 }
 0x20d   : > { %v584_v21 = vsel %vm378_vm1, %v583_v20, %v468_v15  ;;  %v483_v3 = vrot.slane %v482_v5, 1  ;;  %v492_v22 = vadd.f32 %v491_v6, %v490_v9  ;;  %v501_v23 = vadd.f32 %v500_v18, %v499_v11 }
 0x20e   : > { %v510_v24 = vadd.f32 %v509_v19, %v508_v0  ;;  %v515_v26 = vadd.f32 %v514_v52, %v513_v17  ;;  %v523_v13 = vsel %vm236_vm0, %v521_v62, 0.0  ;;  %v585_v25 = vsel %vm380_vm2, %v584_v21, %v477_v16 }
 0x20f   : > { %v484_v27 = vadd.f32 %v483_v3, %v482_v5  ;;  %v493_v28 = vrot.slane %v492_v22, 1  ;;  %v502_v29 = vrot.slane %v501_v23, 1  ;;  %v524_v45 = vrot.slane %v523_v13, 4 }
 0x210   : > { %v511_v31 = vrot.slane %v510_v24, 1  ;;  %v516_v32 = vrot.slane %v515_v26, 2  ;;  %v532_v58 = vsel %vm236_vm0, %v530_v14, 0.0  ;;  %v539_v36 = vrot.slane %v439_v54, 6 }
 0x211   : > { %v494_v33 = vadd.f32 %v493_v28, %v492_v22  ;;  %v503_v34 = vadd.f32 %v502_v29, %v501_v23  ;;  %v533_v35 = vrot.slane %v532_v58, 4  ;;  %v525_v53 = vadd.f32 %v524_v45, %v523_v13 }
 0x212   : > { %v512_v37 = vadd.f32 %v511_v31, %v510_v24  ;;  %v517_v38 = vadd.f32 %v516_v32, %v515_v26  ;;  %v548_v7 = vsel %vm236_vm0, %v442_v30, 0.0  ;;  %v541_v41 = vsel %vm236_vm0, %v539_v36, 0.0 }
 0x213   : > { %v586_v39 = vsel %vm236_vm0, %v484_v27, %v494_v33  ;;  %v534_v40 = vadd.f32 %v533_v35, %v532_v58  ;;  %v549_v61 = vrot.slane %v548_v7, 4  ;;  %v526_v44 = vrot.slane %v525_v53, 2 }
 0x214   : > { %v587_v42 = vsel %vm378_vm1, %v586_v39, %v503_v34  ;;  %v518_v43 = vrot.slane %v517_v38, 1  ;;  %v542_v46 = vrot.slane %v541_v41, 4  ;;  %v595_v49 = vmul.f32 0.0019569471, %v585_v25 }
 0x215   : > { %v535_v50 = vrot.slane %v534_v40, 2  ;;  %v550_v51 = vadd.f32 %v549_v61, %v548_v7  ;;  %v556_v54 = vrot.slane %v442_v30, 2  ;;  %v588_v2 = vsel %vm380_vm2, %v587_v42, %v512_v37 }
 0x216   : > { %v519_v4 = vadd.f32 %v518_v43, %v517_v38  ;;  %v527_v57 = vadd.f32 %v526_v44, %v525_v53  ;;  %v543_v10 = vadd.f32 %v542_v46, %v541_v41  ;;  %v565_v0 = vrot.slane %v442_v30, 4 }
 0x217   : > { %v536_v8 = vadd.f32 %v535_v50, %v534_v40  ;;  %v551_v9 = vrot.slane %v550_v51, 2  ;;  %v558_v11 = vsel %vm236_vm0, %v556_v54, 0.0  ;;  %v574_v17 = vrot.slane %v442_v30, 6 }
 0x218   : > { %v528_v1 = vrot.slane %v527_v57, 1  ;;  %v544_v15 = vrot.slane %v543_v10, 2  ;;  %v559_v16 = vrot.slane %v558_v11, 4  ;;  %v567_v18 = vsel %vm236_vm0, %v565_v0, 0.0 }
 0x219   : > { %v537_v5 = vrot.slane %v536_v8, 1  ;;  %v552_v6 = vadd.f32 %v551_v9, %v550_v51  ;;  %935 = vrsqrt.f32 %v595_v49  ;;  %v568_v62 = vrot.slane %v567_v18, 4 }
 0x21a   : > { %v529_v19 = vadd.f32 %v528_v1, %v527_v57  ;;  %v545_v20 = vadd.f32 %v544_v15, %v543_v10  ;;  %v560_v52 = vadd.f32 %v559_v16, %v558_v11  ;;  %v596_v14 = vmul.f32 0.0019569471, %v588_v2  ;;  %v639_v16 = vld [vmem:[%s1431_s1] sm:$0xff] }
 0x21b   : > { %v538_v21 = vadd.f32 %v537_v5, %v536_v8  ;;  %v576_v3 = vsel %vm236_vm0, %v574_v17, 0.0  ;;  %v569_v26 = vadd.f32 %v568_v62, %v567_v18  ;;  %v553_v28 = vrot.slane %v552_v6, 1 }
 0x21c   : > { %v546_v22 = vrot.slane %v545_v20, 1  ;;  %v589_v23 = vsel %vm236_vm0, %v519_v4, %v529_v19  ;;  %v561_v24 = vrot.slane %v560_v52, 2  ;;  %v577_v25 = vrot.slane %v576_v3, 4 }
 0x21d   : > { %v590_v13 = vsel %vm378_vm1, %v589_v23, %v538_v21  ;;  %v570_v30 = vrot.slane %v569_v26, 2  ;;  %937 = vrsqrt.f32 %v596_v14  ;;  %v554_v35 = vadd.f32 %v553_v28, %v552_v6  ;;  %v641_v23 = vld [vmem:[%s1431_s1 + $0x10] sm:$0xff] }
 0x21e   : > { %v547_v27 = vadd.f32 %v546_v22, %v545_v20  ;;  %v562_v29 = vadd.f32 %v561_v24, %v560_v52  ;;  %v578_v31 = vadd.f32 %v577_v25, %v576_v3  ;;  %vm601_vm3 = vcmp.eq.f32.partialorder %v595_v49, inf  ;;  %v640_v20 = vld [vmem:[%s1431_s1 + $0x8] sm:$0xff]  ;;  %v642_v25 = vld [vmem:[%s1431_s1 + $0x18] sm:$0xff] }
 0x21f   : > { %v571_v58 = vadd.f32 %v570_v30, %v569_v26  ;;  %v604_v61 = vand.u32 2147483648, %v595_v49  ;;  %vm603_vm4 = vcmp.eq.f32.partialorder %v595_v49, 0.0  ;;  %vm608_vm5 = vcmp.eq.f32.partialorder %v596_v14, inf  ;;  %v650_v26 = vld [vmem:[%s1433_s3 + $0x18] sm:$0xff]  ;;  %v686_v30 = vpop.permute.xlu1 %685 }
 0x220   : > { %v591_v32 = vsel %vm380_vm2, %v590_v13, %v547_v27  ;;  %v563_v45 = vrot.slane %v562_v29, 1  ;;  %v579_v34 = vrot.slane %v578_v31, 2  ;;  %v611_v57 = vand.u32 2147483648, %v596_v14 }
 0x221   : > { %v597_v33 = vmul.f32 0.0019569471, %v591_v32  ;;  %v572_v37 = vrot.slane %v571_v58, 1  ;;  %vm610_vm6 = vcmp.eq.f32.partialorder %v596_v14, 0.0 }
 0x222   : > { %v564_v36 = vadd.f32 %v563_v45, %v562_v29  ;;  %v580_v53 = vadd.f32 %v579_v34, %v578_v31  ;;  %v649_v29 = vld [vmem:[%s1433_s3 + $0x10] sm:$0xff]  ;;  %v691_v31 = vpop.permute.xlu0 %690 }
 0x223   : > { %v936_v38 = vpop.eup %935  ;;  %939 = vrsqrt.f32 %v597_v33  ;;  %v573_v7 = vadd.f32 %v572_v37, %v571_v58  ;;  %vm615_vm7 = vcmp.eq.f32.partialorder %v597_v33, inf  ;;  %vm617_vm8 = vcmp.eq.f32.partialorder %v597_v33, 0.0  ;;  %v696_v32 = vpop.permute.xlu1 %695 }
 0x224   : > { %v592_v39 = vsel %vm236_vm0, %v554_v35, %v564_v36  ;;  %v600_v40 = vmul.f32 %v936_v38, %v595_v49  ;;  %v581_v41 = vrot.slane %v580_v53, 1 }
 0x225   : > { %v593_v42 = vsel %vm378_vm1, %v592_v39, %v573_v7 }
 0x226   : > { %v602_v43 = vsel %vm601_vm3, %v595_v49, %v600_v40  ;;  %v582_v44 = vadd.f32 %v581_v41, %v580_v53  ;;  %v618_v49 = vand.u32 2147483648, %v597_v33  ;;  %v701_v45 = vpop.permute.xlu0 %700 }
 0x227   : > { %v605_v46 = vsel %vm603_vm4, %v604_v61, %v602_v43  ;;  %v938_v51 = vpop.eup %937  ;;  %v714_v58 = vpop.permute.xlu1 %713 }
 0x228   : > { %v627_v50 = vadd.f32 1e-10, %v605_v46  ;;  %v594_v54 = vsel %vm380_vm2, %v593_v42, %v582_v44  ;;  %v607_v4 = vmul.f32 %v938_v51, %v596_v14 }
 0x229   : > { %v598_v2 = vmul.f32 0.0019569471, %v594_v54 }
 0x22a   : > { %941 = vrcp.f32 %v627_v50  ;;  %v609_v10 = vsel %vm608_vm5, %v596_v14, %v607_v4 }
 0x22b   : > { %943 = vrsqrt.f32 %v598_v2  ;;  %v612_v9 = vsel %vm610_vm6, %v611_v57, %v609_v10  ;;  %vm622_vm9 = vcmp.eq.f32.partialorder %v598_v2, inf  ;;  %v625_v52 = vand.u32 2147483648, %v598_v2 }
 0x22c   : > { %v628_v11 = vadd.f32 1e-10, %v612_v9  ;;  %vm624_vm10 = vcmp.eq.f32.partialorder %v598_v2, 0.0 }
 0x22d   : > { %v940_v8 = vpop.eup %939 }
 0x22e   : > { %v614_v0 = vmul.f32 %v940_v8, %v597_v33  ;;  %945 = vrcp.f32 %v628_v11 }
 0x230   : > { %v616_v1 = vsel %vm615_vm7, %v597_v33, %v614_v0  ;;  %v719_v33 = vpop.permute.xlu0 %718 }
 0x231   : > { %v619_v15 = vsel %vm617_vm8, %v618_v49, %v616_v1 }
 0x232   : > { %v629_v17 = vadd.f32 1e-10, %v619_v15 }
 0x234   : > { %v942_v5 = vpop.eup %941  ;;  %947 = vrcp.f32 %v629_v17 }
 0x235   : > { %v651_v6 = vmul.f32 %v942_v5, %v639_v16  ;;  %v944_v18 = vpop.eup %943 }
 0x236   : > { %v621_v19 = vmul.f32 %v944_v18, %v598_v2 }
 0x237   : > { %657 = vperm.xlu1 %934, %v651_v6  }
 0x238   : > { %v623_v62 = vsel %vm622_vm9, %v598_v2, %v621_v19  ;;  %v946_v14 = vpop.eup %945 }
 0x239   : > { %v626_v21 = vsel %vm624_vm10, %v625_v52, %v623_v62  ;;  %v652_v3 = vmul.f32 %v946_v14, %v640_v20 }
 0x23a   : > { %v630_v22 = vadd.f32 1e-10, %v626_v21 }
 0x23b   : > { %662 = vperm.xlu0 %933, %v652_v3  }
 0x23c   : > { %949 = vrcp.f32 %v630_v22 }
 0x23e   : > { %v948_v24 = vpop.eup %947 }
 0x23f   : > { %v653_v13 = vmul.f32 %v948_v24, %v641_v23  ;;  %728 = vperm.xlu0 %933, %v650_v26  }
 0x241   : > { %667 = vperm.xlu1 %934, %v653_v13  }
 0x246   : > { %v950_v27 = vpop.eup %949 }
 0x247   : > { %v654_v28 = vmul.f32 %v950_v27, %v642_v25 }
 0x249   : > { %672 = vperm.xlu1 %934, %v654_v28  }
 0x24d   : > { %723 = vperm.xlu1 %934, %v649_v29  }
 0x2b6   : > { %v658_v34 = vpop.permute.xlu1 %657 }
 0x2b7   : > { %v675_v36 = vmul.f32 %v658_v34, %v1263_v47  ;;  %v676_v37 = vmul.f32 %v658_v34, %v1266_v48 }
 0x2b9   : > { %v703_v7 = vadd.f32 %v686_v30, %v675_v36  ;;  %v704_v39 = vadd.f32 %v686_v30, %v676_v37 }
 0x2ba   : > { %v663_v35 = vpop.permute.xlu0 %662 }
 0x2bb   : > { %v677_v38 = vmul.f32 %v663_v35, %v1273_v55  ;;  %v678_v53 = vmul.f32 %v663_v35, %v1276_v56  ;;  %v731_v42 = vmul.f32 %v714_v58, %v703_v7  ;;  %v732_v43 = vmul.f32 %v714_v58, %v704_v39 }
 0x2bd   : > { %v705_v40 = vadd.f32 %v691_v31, %v677_v38  ;;  %v706_v41 = vadd.f32 %v691_v31, %v678_v53  ;;  %vm739_vm11 = vcmp.ge.f32.partialorder %v731_v42, 0.0  ;;  %vm740_vm12 = vcmp.ge.f32.partialorder %v732_v43, 0.0 }
 0x2be   : > { %v729_v57 = vpop.permute.xlu0 %728  ;;  %v747_v10 = vsel %vm739_vm11, %v703_v7, 0.0  ;;  %v748_v8 = vsel %vm740_vm12, %v704_v39, 0.0 }
 0x2bf   : > { %v733_v44 = vmul.f32 %v719_v33, %v705_v40  ;;  %v734_v46 = vmul.f32 %v719_v33, %v706_v41 }
 0x2c0   : > { %v668_v61 = vpop.permute.xlu1 %667 }
 0x2c1   : > { %v679_v50 = vmul.f32 %v668_v61, %v1283_v59  ;;  %v680_v51 = vmul.f32 %v668_v61, %v1286_v60  ;;  %vm741_vm13 = vcmp.ge.f32.partialorder %v733_v44, 0.0  ;;  %vm742_vm14 = vcmp.ge.f32.partialorder %v734_v46, 0.0 }
 0x2c2   : > { %v755_v59 = vsel %vm739_vm11, 0.0, %v703_v7  ;;  %v756_v60 = vsel %vm740_vm12, 0.0, %v704_v39  ;;  %v749_v49 = vsel %vm741_vm13, %v705_v40, 0.0  ;;  %v750_v1 = vsel %vm742_vm14, %v706_v41, 0.0 }
 0x2c3   : > { %v707_v56 = vadd.f32 %v696_v32, %v679_v50  ;;  %v708_v54 = vadd.f32 %v696_v32, %v680_v51  ;;  %v757_v15 = vsel %vm741_vm13, 0.0, %v705_v40  ;;  %v758_v16 = vsel %vm742_vm14, 0.0, %v706_v41 }
 0x2c8   : > { %v673_v47 = vpop.permute.xlu1 %672 }
 0x2c9   : > { %v681_v48 = vmul.f32 %v673_v47, %v1293_v12  ;;  %v682_v55 = vmul.f32 %v673_v47, %v1296_v63 }
 0x2cb   : > { %v709_v2 = vadd.f32 %v701_v45, %v681_v48  ;;  %v710_v4 = vadd.f32 %v701_v45, %v682_v55 }
 0x2cc   : > { %v724_v9 = vpop.permute.xlu1 %723 }
 0x2cd   : > { %v737_v11 = vmul.f32 %v729_v57, %v709_v2  ;;  %v738_v12 = vmul.f32 %v729_v57, %v710_v4  ;;  %v735_v0 = vmul.f32 %v724_v9, %v707_v56  ;;  %v736_v63 = vmul.f32 %v724_v9, %v708_v54 }
 0x2cf   : > { %vm745_vm15 = vcmp.ge.f32.partialorder %v737_v11, 0.0  ;;  %vm746_vm0 = vcmp.ge.f32.partialorder %v738_v12, 0.0  ;;  %vm743_vm1 = vcmp.ge.f32.partialorder %v735_v0, 0.0  ;;  %vm744_vm2 = vcmp.ge.f32.partialorder %v736_v63, 0.0 }
 0x2d0   : > { %v753_v17 = vsel %vm745_vm15, %v709_v2, 0.0  ;;  %v754_v5 = vsel %vm746_vm0, %v710_v4, 0.0  ;;  %v761_v6 = vsel %vm745_vm15, 0.0, %v709_v2  ;;  %v762_v18 = vsel %vm746_vm0, 0.0, %v710_v4 }
 0x2d1   : > { %v765_v19 = vadd.f32 %v761_v6, %v749_v49  ;;  %v766_v20 = vadd.f32 %v762_v18, %v750_v1  ;;  %v769_v52 = vadd.f32 %v757_v15, %v753_v17  ;;  %v770_v62 = vadd.f32 %v758_v16, %v754_v5 }
 0x2d2   : > { %v751_v14 = vsel %vm743_vm1, %v707_v56, 0.0  ;;  %v752_v21 = vsel %vm744_vm2, %v708_v54, 0.0  ;;  %v759_v3 = vsel %vm743_vm1, 0.0, %v707_v56  ;;  %v760_v22 = vsel %vm744_vm2, 0.0, %v708_v54 }
 0x2d3   : > { %773 = vst [vmem:[%s215_s6 + $0x10] sm:$0xff] %v765_v19  ;;  %774 = vst [vmem:[%s215_s6 + $0x18] sm:$0xff] %v766_v20  ;;  %v763_v23 = vadd.f32 %v759_v3, %v747_v10  ;;  %v764_v24 = vadd.f32 %v760_v22, %v748_v8  ;;  %v767_v26 = vadd.f32 %v755_v59, %v751_v14 }
 0x2d4   : > { %777 = vst [vmem:[%s215_s6 + $0x30] sm:$0xff] %v769_v52  ;;  %778 = vst [vmem:[%s215_s6 + $0x38] sm:$0xff] %v770_v62  ;;  %v768_v13 = vadd.f32 %v756_v60, %v752_v21 }
 0x2d5   : > { %771 = vst [vmem:[%s215_s6] sm:$0xff] %v763_v23  ;;  %772 = vst [vmem:[%s215_s6 + $0x8] sm:$0xff] %v764_v24 }
 0x2d6   : > { %775 = vst [vmem:[%s215_s6 + $0x20] sm:$0xff] %v767_v26  ;;  %776 = vst [vmem:[%s215_s6 + $0x28] sm:$0xff] %v768_v13 }
 0x2d7   : > { %994 = shalt.err (!%p991_p2)
}
 0x2d8   : > { %s995_s11 = scalar_lea.hbm %s1384_s19, 1024  ;;  %s999_s25 = scalar_lea.hbm %s1434_s4, 2048 }
 0x2d9   : > { %p996_p4 = scmp.ne.s32.totalorder %s1384_s19, %s995_s11  ;;  %p1000_p9 = scmp.lt.u32.totalorder %s1384_s19, %s1434_s4 }
 0x2da   : > { %p1001_p1 = scmp.lt.u32.totalorder %s999_s25, %s995_s11  ;;  %p1003_p6 = scmp.lt.u32.totalorder %s995_s11, %s1384_s19 }
 0x2db   : > { %p997_p5 = pnand %p996_p4, %p1441_p11 }
 0x2dc   : > { %p1002_p3 = por %p1001_p1, %p1000_p9 }
 0x2dd   : > { %p998_p7 = pneg %p997_p5 }
 0x2de   : > { %p1004_p12 = por %p1003_p6, %p1002_p3 }
 0x2e0   : > { %p1005_p13 = pnand %p1004_p12, %p998_p7 }
 0x2e2   : > { %1008 = shalt.err (!%p1005_p13)
}
 0x2e3   : > { %s1054_s5 = smov 256   ;;  %s1055_s6 = smov 16  }
 0x2e4   : > { %884 = dma.vmem_to_hbm [thread:$0]  (%p1441_p11), %s1386_s7, 1024, %s1384_s19, %s780_s14, %s1054_s5, %s1054_s5, %s1055_s6  }
 0x2e5 PF: > { %s808_s9 = sand.u32 1, %s1035_s15   ;;  %p1442_p8 = scmp.ne.s32.totalorder %s1439_s28, 0 }
 0x2e6   : > { %p1443_p10 = scmp.ge.s32.totalorder %s1047_s18, 2  ;;  %s809_s20 = scalar_lea.sflag [#allocation4], %s808_s9 }
 0x2e8   : > { %p891_p0 = pnand %p1443_p10, %p1442_p8 }
 0x2ea   : > { %1030 = dma.done.wait (!%p891_p0), %s809_s20, 1024  }
 0x2eb   : > { %1032 = vsyncadd (!%p891_p0), %s809_s20, 4294966272  ;;  %p17_p2 = scmp.ge.s32.totalorder %s1106_s21, 4   ;;  %s1444_s15 = smov %s1039_s16 }
 0x2ec   : > { %s1445_s16 = smov %s1043_s17  ;;  %s1446_s17 = smov %s1118_s24 }
 0x2ed   : > { %s1447_s18 = smov %s1106_s21  ;;  %19 = sbr.rel (!%p17_p2) target bundleno = 5 (0x5), region = 81 }
 0x2f4   :  { %814 = vsyncpa [#allocation3], 1 }
 0x2f5   :  { %816 = vsyncpa [#allocation3 + $0x1], 1 }
 0x2f6   :  { %817 = vsyncpa [#allocation4], 1 }
 0x2f7   :  { %819 = vsyncpa [#allocation4 + $0x1], 1 }

</bundles_post_ra>
